<compile_context>
chip_gen: v5e
topology: v5e:2x2
jax: 0.10.0
libtpu: 0.0.40
codegen_flags: <defaults>
</compile_context>

<pallas_src>
import functools

import jax
import jax.numpy as jnp
import numpy as np
from jax.experimental import pallas as pl
from jax.experimental.pallas import tpu as pltpu


def _hesstrans_energy_kernel(dvt_ref, hinv_ref, out_ref, acc_ref, *, inv_denom):
    """Grid = (n_j output-column tiles, n_k contraction tiles).

    dvt_ref  : (M_pad, TK)    VMEM — stacked time-differences of the vertex
               sequence; row m is one coordinate (x/y/z) of vert[t+1]-vert[t]
               over TK vertices (lane axis). Rows beyond (T-1)*3 are zero pad.
    hinv_ref : (TK, TN)       VMEM — tile of the (symmetrized) hess_inv.
    out_ref  : (1, 8, 128)    VMEM — per-output-tile partial energy, broadcast
               over the block (summed in the wrapper).
    acc_ref  : (M_pad, TN) f32 VMEM scratch — dvs accumulator across k.
    """
    k = pl.program_id(1)

    @pl.when(k == 0)
    def _():
        acc_ref[...] = jnp.zeros_like(acc_ref)

    # dvs[:, j_tile] += dvt[:, k_tile] @ hinv[k_tile, j_tile]
    # Single MXU matmul per grid step, f32 accumulation. Zero-padded rows /
    # columns contribute exactly zero to the energy.
    acc_ref[...] += jnp.dot(
        dvt_ref[...], hinv_ref[...], preferred_element_type=jnp.float32
    )

    @pl.when(k == pl.num_programs(1) - 1)
    def _():
        a = acc_ref[...]
        partial = jnp.sum(a * a) * inv_denom          # one cross-lane reduce
        out_ref[...] = jnp.zeros_like(out_ref) + partial


@functools.partial(jax.jit, static_argnames=("compute_dtype",))
def hesstrans_forward(hess_inv, vert_sequence, *, compute_dtype=jnp.float32):
    """Pallas forward pass.

    hess_inv:      (N, N) f32  (inverse of an SPD hessian)
    vert_sequence: (T, N, 3) f32
    returns (E_total, [E_total])
    """
    num_t, n_vert, d = vert_sequence.shape
    if num_t < 2:
        raise ValueError("hesstrans_forward requires num_t >= 2 "
                         "(the reference divides by num_t - 1).")

    f32 = jnp.float32
    vseq = vert_sequence.astype(f32)
    hinv = hess_inv.astype(f32)

    # hess_inv is the inverse of an SPD matrix, hence symmetric up to rounding.
    # Symmetrize once so the kernel can contract against it WITHOUT a transpose
    # (dvt @ hinv == (hinv @ dv)^T exactly for symmetric hinv). In a real
    # module this would be hoisted to __init__ alongside the inversion.
    hinv = 0.5 * (hinv + hinv.T)

    # Diff-first (exact by linearity): hess_inv @ (v[t+1]-v[t]) = v_s[t+1]-v_s[t].
    dv = vseq[1:] - vseq[:-1]                                    # (T-1, N, 3)
    # Lane-dense layout: coordinate/timestep on sublanes, vertex index on lanes.
    dvt = jnp.transpose(dv, (0, 2, 1)).reshape((num_t - 1) * d, n_vert)

    itemsize = jnp.dtype(compute_dtype).itemsize
    sub = 8 * (4 // itemsize)                 # sublane multiple: 8 (f32), 16 (bf16)
    m = (num_t - 1) * d
    m_pad = ((m + sub - 1) // sub) * sub
    n_pad = ((n_vert + 127) // 128) * 128

    dvt = jnp.pad(dvt, ((0, m_pad - m), (0, n_pad - n_vert))).astype(compute_dtype)
    if n_pad != n_vert:
        hinv = jnp.pad(hinv, ((0, n_pad - n_vert), (0, n_pad - n_vert)))
    hinv = hinv.astype(compute_dtype)

    # Tile the N x N matrix: contraction (k) and output-column (j) tiles.
    tile = 128
    for cand in (512, 256):
        if n_pad % cand == 0:
            tile = cand
            break
    tk = tn = tile
    n_j = n_pad // tn
    n_k = n_pad // tk

    # VMEM budget: double-buffered input tiles + f32 accumulator + output blocks.
    vmem_bytes = (2 * (m_pad * tk + tk * tn) * itemsize
                  + m_pad * tn * 4
                  + 2 * 8 * 128 * 4)
    vmem_limit = int(min(max(2 * vmem_bytes, 16 << 20), 64 << 20))

    cost = pl.CostEstimate(
        flops=2 * m * n_pad * n_pad,
        transcendentals=0,
        bytes_accessed=(n_pad * n_pad + n_j * m_pad * n_pad) * itemsize
        + n_j * 8 * 128 * 4,
    )

    kernel = functools.partial(
        _hesstrans_energy_kernel, inv_denom=1.0 / float(num_t - 1)
    )

    out = pl.pallas_call(
        kernel,
        out_shape=jax.ShapeDtypeStruct((n_j, 8, 128), jnp.float32),
        grid_spec=pltpu.PrefetchScalarGridSpec(
            num_scalar_prefetch=0,
            grid=(n_j, n_k),
            in_specs=[
                pl.BlockSpec((m_pad, tk), lambda j, k: (0, k)),   # dvt
                pl.BlockSpec((tk, tn), lambda j, k: (k, j)),      # hess_inv tile
            ],
            out_specs=pl.BlockSpec((1, 8, 128), lambda j, k: (j, 0, 0)),
            scratch_shapes=[pltpu.VMEM((m_pad, tn), jnp.float32)],
        ),
        compiler_params=pltpu.CompilerParams(
            dimension_semantics=("parallel", "arbitrary"),
            vmem_limit_bytes=vmem_limit,
        ),
        cost_estimate=cost,
    )(dvt, hinv)

    # Per-output-tile partial energies -> total (tiny reduce, fused by XLA).
    e_total = jnp.sum(out[:, 0, 0])
    return e_total, [e_total]


def build_module_params(key, num_t=5, n_vert=128):
    """Deterministic synthetic stand-ins for the module's __init__ state."""
    k1, k2, k3 = jax.random.split(key, 3)

    # Synthetic dense "neighbor hessian" (SPD, well conditioned): A @ A^T / N + I
    a = jax.random.normal(k1, (n_vert, n_vert), dtype=jnp.float32)
    neigh_hess = a @ a.T / n_vert + jnp.eye(n_vert, dtype=jnp.float32)
    hess = neigh_hess + 0.001 * jnp.eye(n_vert, dtype=jnp.float32)   # as in __init__
    hess_inv = jnp.linalg.inv(hess)

    # shape_x / shape_y vertices
    vert_x = jax.random.normal(k2, (n_vert, 3), dtype=jnp.float32)
    vert_y = jax.random.normal(k3, (n_vert, 3), dtype=jnp.float32)

    # compute_vertices(): linear blend between endpoints, then pre-multiply by hess
    lam = jnp.arange(num_t, dtype=jnp.float32)[:, None, None] / (num_t - 1)
    blend = (1.0 - lam) * vert_x[None] + lam * vert_y[None]          # (T, N, 3)
    vert_sequence = jnp.einsum(
        "ij,tjd->tid", hess, blend, precision=jax.lax.Precision.HIGHEST
    )
    return hess, hess_inv, vert_sequence


def reference_forward(hess_inv, vert_sequence):
    """Pure-JAX reference of the same forward pass (high precision)."""
    num_t = vert_sequence.shape[0]
    v_s = jnp.einsum(
        "ij,tjd->tid", hess_inv, vert_sequence, precision=jax.lax.Precision.HIGHEST
    )
    diffs = v_s[1:] - v_s[:-1]
    return jnp.sum(diffs * diffs) / (num_t - 1)


if __name__ == "__main__":
    key = jax.random.PRNGKey(0)
    NUM_T = 5        # param.num_timesteps
    N_VERT = 128     # number of mesh vertices

    hess, hess_inv, vert_sequence = build_module_params(key, NUM_T, N_VERT)

    e_ref = jax.block_until_ready(reference_forward(hess_inv, vert_sequence))

    # float32 path (tight tolerance)
    e_f32, e_list = hesstrans_forward(hess_inv, vert_sequence)
    e_f32 = jax.block_until_ready(e_f32)
    assert isinstance(e_list, list) and len(e_list) == 1
    np.testing.assert_allclose(np.asarray(e_f32), np.asarray(e_ref),
                               rtol=5e-3, atol=1e-4)

    # bfloat16 compute path (halves the dominant N^2 HBM read; looser tolerance)
    e_bf16, _ = hesstrans_forward(hess_inv, vert_sequence,
                                  compute_dtype=jnp.bfloat16)
    e_bf16 = jax.block_until_ready(e_bf16)
    np.testing.assert_allclose(np.asarray(e_bf16), np.asarray(e_ref),
                               rtol=2e-2, atol=1e-3)

    print("KERNEL_OK")
</pallas_src>

<mosaic_0001>
module attributes {stable_mosaic.version = 11 : i64} {
  func.func @_hesstrans_energy_kernel(%arg0: i32, %arg1: i32, %arg2: memref<16x128xf32, #tpu.memory_space<vmem>>, %arg3: memref<128x128xf32, #tpu.memory_space<vmem>>, %arg4: memref<1x8x128xf32, #tpu.memory_space<vmem>>, %arg5: memref<16x128xf32, #tpu.memory_space<vmem>>) attributes {dimension_semantics = [#tpu.dimension_semantics<parallel>, #tpu.dimension_semantics<arbitrary>], iteration_bounds = array<i64: 1, 1>, scalar_prefetch = 0 : i64, scratch_operands = 1 : i64, tpu.core_type = #tpu.core_type<tc>, window_params = [{transform_indices = @transform_0, window_bounds = array<i64: 16, 128>}, {transform_indices = @transform_1, window_bounds = array<i64: 128, 128>}, {transform_indices = @transform_2, window_bounds = array<i64: 1, 8, 128>}]} {
    %c0_i32 = arith.constant 0 : i32
    %0 = arith.cmpi eq, %arg1, %c0_i32 : i32
    %1 = arith.extui %0 : i1 to i32
    %c0_i32_0 = arith.constant 0 : i32
    %2 = arith.cmpi ne, %1, %c0_i32_0 : i32
    scf.if %2 {
      %cst_10 = arith.constant 0.000000e+00 : f32
      %12 = vector.broadcast %cst_10 : f32 to vector<16x128xf32>
      %c0_11 = arith.constant 0 : index
      %c0_12 = arith.constant 0 : index
      %13 = vector.load %arg5[%c0_11, %c0_12] : memref<16x128xf32, #tpu.memory_space<vmem>>, vector<16x128xf32>
      tpu.vector_store %arg5[%c0_11, %c0_12], %12 {strides = array<i32>} : memref<16x128xf32, #tpu.memory_space<vmem>>, vector<16x128xf32>,
    } else {
    }
    %c0 = arith.constant 0 : index
    %c0_1 = arith.constant 0 : index
    %3 = vector.load %arg5[%c0, %c0_1] : memref<16x128xf32, #tpu.memory_space<vmem>>, vector<16x128xf32>
    %c0_2 = arith.constant 0 : index
    %c0_3 = arith.constant 0 : index
    %4 = vector.load %arg2[%c0_2, %c0_3] : memref<16x128xf32, #tpu.memory_space<vmem>>, vector<16x128xf32>
    %c0_4 = arith.constant 0 : index
    %c0_5 = arith.constant 0 : index
    %5 = vector.load %arg3[%c0_4, %c0_5] : memref<128x128xf32, #tpu.memory_space<vmem>>, vector<128x128xf32>
    %cst = arith.constant dense<0.000000e+00> : vector<16x128xf32>
    %6 = tpu.matmul %4, %5, %cst {dimension_numbers = #tpu.dot_dimension_numbers<[1], [0], [0], [1], [0, 0, 1, 1], [], []>} : vector<16x128xf32>, vector<128x128xf32>, vector<16x128xf32> -> vector<16x128xf32>
    %7 = arith.addf %3, %6 : vector<16x128xf32>
    %c0_6 = arith.constant 0 : index
    %c0_7 = arith.constant 0 : index
    %8 = vector.load %arg5[%c0_6, %c0_7] : memref<16x128xf32, #tpu.memory_space<vmem>>, vector<16x128xf32>
    tpu.vector_store %arg5[%c0_6, %c0_7], %7 {strides = array<i32>} : memref<16x128xf32, #tpu.memory_space<vmem>>, vector<16x128xf32>,
    %c0_i32_8 = arith.constant 0 : i32
    %9 = arith.cmpi eq, %arg1, %c0_i32_8 : i32
    %10 = arith.extui %9 : i1 to i32
    %c0_i32_9 = arith.constant 0 : i32
    %11 = arith.cmpi ne, %10, %c0_i32_9 : i32
    scf.if %11 {
      %c0_10 = arith.constant 0 : index
      %c0_11 = arith.constant 0 : index
      %12 = vector.load %arg5[%c0_10, %c0_11] : memref<16x128xf32, #tpu.memory_space<vmem>>, vector<16x128xf32>
      %13 = arith.mulf %12, %12 : vector<16x128xf32>
      %14 = vector.shape_cast %13 : vector<16x128xf32> to vector<1x16x128xf32>
      %cst_12 = arith.constant dense<0.000000e+00> : vector<1xf32>
      %15 = vector.multi_reduction <add>, %14, %cst_12 [1, 2] : vector<1x16x128xf32> to vector<1xf32>
      %16 = vector.shape_cast %15 : vector<1xf32> to vector<1x1x1xf32>
      %17 = vector.extract %16[0, 0, 0] : f32 from vector<1x1x1xf32>
      %cst_13 = arith.constant 2.500000e-01 : f32
      %18 = arith.mulf %17, %cst_13 : f32
      %cst_14 = arith.constant 0.000000e+00 : f32
      %19 = vector.broadcast %cst_14 : f32 to vector<1x8x128xf32>
      %20 = vector.broadcast %18 : f32 to vector<1x8x128xf32>
      %21 = arith.addf %19, %20 : vector<1x8x128xf32>
      %c0_15 = arith.constant 0 : index
      %c0_16 = arith.constant 0 : index
      %c0_17 = arith.constant 0 : index
      %22 = vector.load %arg4[%c0_15, %c0_16, %c0_17] : memref<1x8x128xf32, #tpu.memory_space<vmem>>, vector<1x8x128xf32>
      tpu.vector_store %arg4[%c0_15, %c0_16, %c0_17], %21 {strides = array<i32>} : memref<1x8x128xf32, #tpu.memory_space<vmem>>, vector<1x8x128xf32>,
    } else {
    }
    return
  }
  func.func @transform_0(%arg0: i32, %arg1: i32) -> (i32, i32) {
    %c0_i32 = arith.constant 0 : i32
    %c0_i32_0 = arith.constant 0 : i32
    return %c0_i32, %arg1 : i32, i32
  }
  func.func @transform_1(%arg0: i32, %arg1: i32) -> (i32, i32) {
    %c0_i32 = arith.constant 0 : i32
    return %arg1, %arg0 : i32, i32
  }
  func.func @transform_2(%arg0: i32, %arg1: i32) -> (i32, i32, i32) {
    %c0_i32 = arith.constant 0 : i32
    %c0_i32_0 = arith.constant 0 : i32
    %c0_i32_1 = arith.constant 0 : i32
    return %arg0, %c0_i32, %c0_i32_0 : i32, i32, i32
  }
}

</mosaic_0001>

<bundles_post_ra>
// kernel: hesstrans_forward.1
= control target key start
LH: loop header
LB: loop body
LE: loop exit
PB: predicated region body
PF: predicated region fallthrough
CT: control target
= control target key end

     0   :  { %s179_s1 = inlined_call_operand.vmem [shape: f32[128,128], index: 1, kind: input, shape index: {}]   ;;  %s180_s0 = inlined_call_operand.vmem [shape: f32[16,128], index: 0, kind: input, shape index: {}]   ;;  %s181_s2 = inlined_call_operand.vmem [shape: f32[1,8,128], index: 2, kind: output, shape index: {}]  }
   0x1   :  { %v36_v0 = vld [vmem:[%s179_s1 + $0x78] sm:$0xff]  ;;  %v35_v1 = vld [vmem:[%s179_s1 + $0x70] sm:$0xff]  ;;  %v34_v2 = vld [vmem:[%s179_s1 + $0x68] sm:$0xff] }
   0x2   :  { %37 = vmatpush.msra.mxu0 %v36_v0  ;;  %89 = vmatpush.msra.mxu1 %v36_v0  ;;  %v33_v3 = vld [vmem:[%s179_s1 + $0x60] sm:$0xff]  ;;  %v32_v4 = vld [vmem:[%s179_s1 + $0x58] sm:$0xff]  ;;  %v31_v5 = vld [vmem:[%s179_s1 + $0x50] sm:$0xff] }
   0x3   :  { %v30_v6 = vld [vmem:[%s179_s1 + $0x48] sm:$0xff]  ;;  %v29_v7 = vld [vmem:[%s179_s1 + $0x40] sm:$0xff]  ;;  %v28_v8 = vld [vmem:[%s179_s1 + $0x38] sm:$0xff] }
   0x4   :  { %38 = vmatpush.msra.mxu0 %v35_v1  ;;  %90 = vmatpush.msra.mxu1 %v35_v1  ;;  %v27_v9 = vld [vmem:[%s179_s1 + $0x30] sm:$0xff]  ;;  %v26_v10 = vld [vmem:[%s179_s1 + $0x28] sm:$0xff]  ;;  %v25_v11 = vld [vmem:[%s179_s1 + $0x20] sm:$0xff] }
   0x5   :  { %v24_v12 = vld [vmem:[%s179_s1 + $0x18] sm:$0xff]  ;;  %v23_v13 = vld [vmem:[%s179_s1 + $0x10] sm:$0xff]  ;;  %v22_v14 = vld [vmem:[%s179_s1 + $0x8] sm:$0xff] }
   0x6   :  { %39 = vmatpush.msra.mxu0 %v34_v2  ;;  %91 = vmatpush.msra.mxu1 %v34_v2  ;;  %v21_v15 = vld [vmem:[%s179_s1] sm:$0xff]  ;;  %v20_v17 = vld [vmem:[%s180_s0 + $0x8] sm:$0xff] }
   0x7   :  { %v19_v16 = vld [vmem:[%s180_s0] sm:$0xff] }
   0x8   :  { %40 = vmatpush.msra.mxu0 %v33_v3  ;;  %92 = vmatpush.msra.mxu1 %v33_v3 }
   0xa   :  { %41 = vmatpush.msra.mxu0 %v32_v4  ;;  %93 = vmatpush.msra.mxu1 %v32_v4 }
   0xc   :  { %42 = vmatpush.msra.mxu0 %v31_v5  ;;  %94 = vmatpush.msra.mxu1 %v31_v5 }
   0xe   :  { %43 = vmatpush.msra.mxu0 %v30_v6  ;;  %95 = vmatpush.msra.mxu1 %v30_v6 }
  0x10   :  { %44 = vmatpush.msra.mxu0 %v29_v7  ;;  %96 = vmatpush.msra.mxu1 %v29_v7 }
  0x12   :  { %45 = vmatpush.msra.mxu0 %v28_v8  ;;  %97 = vmatpush.msra.mxu1 %v28_v8 }
  0x14   :  { %46 = vmatpush.msra.mxu0 %v27_v9  ;;  %98 = vmatpush.msra.mxu1 %v27_v9 }
  0x16   :  { %47 = vmatpush.msra.mxu0 %v26_v10  ;;  %99 = vmatpush.msra.mxu1 %v26_v10 }
  0x18   :  { %48 = vmatpush.msra.mxu0 %v25_v11  ;;  %100 = vmatpush.msra.mxu1 %v25_v11 }
  0x1a   :  { %49 = vmatpush.msra.mxu0 %v24_v12  ;;  %101 = vmatpush.msra.mxu1 %v24_v12 }
  0x1c   :  { %50 = vmatpush.msra.mxu0 %v23_v13  ;;  %102 = vmatpush.msra.mxu1 %v23_v13 }
  0x1e   :  { %51 = vmatpush.msra.mxu0 %v22_v14  ;;  %103 = vmatpush.msra.mxu1 %v22_v14 }
  0x20   :  { %52 = vmatpush.msra.mxu0 %v21_v15  ;;  %104 = vmatpush.msra.mxu1 %v21_v15 }
  0x21   :  { %53 = vmatmul.f32.vlgmr.msra.gmra.mxu0 %v19_v16  ;;  %56 = vmatmul.f32.vlgmr.msra.gmra.mxu1 %v20_v17 }
  0x9e   :  { %v54_v18 = vpop.f32.mrf.mxu0  ;;  %v57_v19 = vpop.f32.mrf.mxu1 }
  0x9f   :  { %v69_v20 = vmul.f32 %v54_v18, %v54_v18  ;;  %v70_v21 = vmul.f32 %v57_v19, %v57_v19 }
  0xa1   :  { %v71_v22 = vadd.f32 %v70_v21, %v69_v20 }
  0xa3   :  { %72 = vadd.xlane.f32.xlu0 %v71_v22 }
 0x116   :  { %v73_v23 = vpop.xlane.xlu0 %72 }
 0x117   :  { %v74_v24 = vrot.slane %v73_v23, 4 }
 0x119   :  { %v75_v25 = vadd.f32 %v74_v24, %v73_v23 }
 0x11b   :  { %v76_v26 = vrot.slane %v75_v25, 2 }
 0x11d   :  { %v77_v27 = vadd.f32 %v76_v26, %v75_v25 }
 0x11f   :  { %v78_v28 = vrot.slane %v77_v27, 1 }
 0x121   :  { %v79_v29 = vadd.f32 %v78_v28, %v77_v27 }
 0x123   :  { %105 = vpush %v79_v29 }
 0x154   :  { %s106_s1 = spop %105 }
 0x155   :  { %s81_s0 = smul.f32 0.25, %s106_s1 }
 0x157   :  { %v82_v30 = vstv %s81_s0 }
 0x158   :  { %84 = vst [vmem:[%s181_s2] sm:$0xff] %v82_v30 }

</bundles_post_ra>
